<compile_context>
chip_gen: v5e
topology: v5e:2x2
jax: 0.10.0
libtpu: 0.0.40
codegen_flags: <defaults>
</compile_context>

<pallas_src>
import functools

import jax
import jax.numpy as jnp
from jax.experimental import pallas as pl
from jax.experimental.pallas import tpu as pltpu

LANE = 128
SUBLANE = 8


def _round_up(x, m):
    return ((x + m - 1) // m) * m


def _pick_tile(dim_pad, cap=512):
    """Largest tile <= cap that divides dim_pad (dim_pad is a multiple of 128)."""
    t = max(min(dim_pad, cap), LANE)
    while dim_pad % t != 0:
        t -= LANE
    return t


def _tpu_generation():
    """Best-effort (vmem_bytes, tensorcores_per_device) for the local TPU."""
    vmem = None
    try:
        vmem = int(pltpu.get_tpu_info().vmem_capacity_bytes)
    except Exception:
        vmem = None
    kind = ""
    try:
        kind = jax.devices()[0].device_kind.lower()
    except Exception:
        pass
    if vmem is None:
        vmem = (64 << 20) if "v7" in kind else (128 << 20)
    two_tc = any(tag in kind for tag in ("v7", "v5p", "v4", "v3"))
    return vmem, (2 if two_tc else 1)


# ------------------------- param preparation (once, off the hot path) -------

def prepare_mlp_params(params, n_in, *, compute_dtype=jnp.float32):
    """Zero-pad to lane multiples and cast to compute_dtype ONCE at init time.

    params: list of (w, b) with w shaped (in_features, out_features) and
    b shaped (out_features,).  Zero padding keeps the math exact: padded input
    lanes are 0, padded weight rows/cols and bias lanes are 0, and ReLU(0)=0,
    so padded lanes stay 0 through every layer.
    """
    compute_dtype = jnp.dtype(compute_dtype)
    dims = [int(n_in)] + [int(w.shape[1]) for (w, _) in params]
    dims_pad = [_round_up(d, LANE) for d in dims]
    weights, biases = [], []
    for li, (w, b) in enumerate(params):
        kp, np_ = dims_pad[li], dims_pad[li + 1]
        w_pad = (
            jnp.zeros((kp, np_), compute_dtype)
            .at[: w.shape[0], : w.shape[1]]
            .set(w.astype(compute_dtype))
        )
        b_pad = jnp.zeros((1, np_), jnp.float32).at[0, : b.shape[0]].set(b.astype(jnp.float32))
        weights.append(w_pad)
        biases.append(b_pad)
    return {
        "dims": dims,
        "dims_pad": dims_pad,
        "weights": weights,
        "biases": biases,
        "compute_dtype": compute_dtype,
    }


# ------------------------- kernels -------------------------

def _mlp_fused_kernel(*refs, n_layers, with_relu, compute_dtype):
    # refs = (x_ref, w1_ref, b1_ref, ..., wL_ref, bL_ref, o_ref)
    x_ref = refs[0]
    o_ref = refs[-1]
    wb = refs[1:-1]

    h = x_ref[...]                                        # already compute_dtype
    for li in range(n_layers):
        w = wb[2 * li][...]                               # (Kpad, Npad), compute_dtype
        b = wb[2 * li + 1][...]                           # (1, Npad), f32
        y = jnp.dot(h, w, preferred_element_type=jnp.float32) + b   # MXU, f32 acc
        if with_relu and li != n_layers - 1:
            y = jnp.maximum(y, 0.0)                       # f32 VPU epilogue
        h = y if li == n_layers - 1 else y.astype(compute_dtype)
    o_ref[...] = h.astype(o_ref.dtype)


def _linear_kernel(x_ref, w_ref, b_ref, o_ref, acc_ref, *, relu):
    # Streamed-weight single Linear: grid = (M, N, K), K is the reduction axis.
    k = pl.program_id(2)

    @pl.when(k == 0)
    def _():
        acc_ref[...] = jnp.zeros_like(acc_ref)

    acc_ref[...] += jnp.dot(x_ref[...], w_ref[...], preferred_element_type=jnp.float32)

    @pl.when(k == pl.num_programs(2) - 1)
    def _():
        y = acc_ref[...] + b_ref[...]
        if relu:
            y = jnp.maximum(y, 0.0)
        o_ref[...] = y.astype(o_ref.dtype)


# ------------------------- runners -------------------------

def _run_fused(prep, x_op, out_dtype, with_relu, tm, grid, vmem_limit, cost,
               single_buffer_weights):
    dims_pad = prep["dims_pad"]
    n_layers = len(prep["weights"])
    m_pad = x_op.shape[0]

    # Streamed activations; resident (constant-index) weights/biases.
    in_specs = [pl.BlockSpec((tm, dims_pad[0]), lambda i: (i, 0))]
    operands = [x_op]
    w_kwargs = {}
    if single_buffer_weights and hasattr(pl, "Buffered"):
        # Resident blocks are fetched once; single-buffering halves their
        # VMEM footprint (the fit/no-fit difference on 64-MiB v7x VMEM).
        w_kwargs = dict(pipeline_mode=pl.Buffered(1))
    for li in range(n_layers):
        kp, np_ = dims_pad[li], dims_pad[li + 1]
        in_specs.append(pl.BlockSpec((kp, np_), lambda i: (0, 0), **w_kwargs))
        in_specs.append(pl.BlockSpec((1, np_), lambda i: (0, 0), **w_kwargs))
        operands += [prep["weights"][li], prep["biases"][li]]
    out_specs = pl.BlockSpec((tm, dims_pad[-1]), lambda i: (i, 0))   # lane-dense out

    kernel = functools.partial(
        _mlp_fused_kernel,
        n_layers=n_layers,
        with_relu=bool(with_relu),
        compute_dtype=prep["compute_dtype"],
    )
    return pl.pallas_call(
        kernel,
        out_shape=jax.ShapeDtypeStruct((m_pad, dims_pad[-1]), out_dtype),
        grid_spec=pltpu.PrefetchScalarGridSpec(
            num_scalar_prefetch=0,
            grid=grid,
            in_specs=in_specs,
            out_specs=out_specs,
        ),
        compiler_params=pltpu.CompilerParams(
            dimension_semantics=("parallel",),
            vmem_limit_bytes=vmem_limit,
        ),
        cost_estimate=cost,
    )(*operands)


def _run_streamed(prep, x_op, out_dtype, with_relu, tm, vmem_bytes):
    """Fallback for MLPs whose padded weights do not fit VMEM: each layer is an
    M/N/K-tiled matmul with an f32 VMEM accumulator (pl.when init/finalize)."""
    dims_pad = prep["dims_pad"]
    n_layers = len(prep["weights"])
    m_pad = x_op.shape[0]
    cdt = prep["compute_dtype"]
    vmem_limit = int(min(vmem_bytes * 0.75, 96 << 20))

    h = x_op
    for li in range(n_layers):
        kp, np_ = dims_pad[li], dims_pad[li + 1]
        tk = _pick_tile(kp, 512)
        tn = _pick_tile(np_, 512)
        last = li == n_layers - 1
        layer_out_dtype = out_dtype if last else cdt
        relu = bool(with_relu) and not last
        kernel = functools.partial(_linear_kernel, relu=relu)
        h = pl.pallas_call(
            kernel,
            out_shape=jax.ShapeDtypeStruct((m_pad, np_), layer_out_dtype),
            grid_spec=pltpu.PrefetchScalarGridSpec(
                num_scalar_prefetch=0,
                grid=(m_pad // tm, np_ // tn, kp // tk),
                in_specs=[
                    pl.BlockSpec((tm, tk), lambda i, j, k: (i, k)),
                    pl.BlockSpec((tk, tn), lambda i, j, k: (k, j)),
                    pl.BlockSpec((1, tn), lambda i, j, k: (0, j)),
                ],
                out_specs=pl.BlockSpec((tm, tn), lambda i, j, k: (i, j)),
                scratch_shapes=[pltpu.VMEM((tm, tn), jnp.float32)],
            ),
            compiler_params=pltpu.CompilerParams(
                dimension_semantics=("parallel", "parallel", "arbitrary"),
                vmem_limit_bytes=vmem_limit,
            ),
        )(h, prep["weights"][li], prep["biases"][li])
    return h


# ------------------------- public wrapper -------------------------

def mlp_pallas(prep, x, with_relu, *, vmem_budget_bytes=None):
    """Forward pass of MLP (Linear [+ReLU]) ... Linear using prepared params."""
    M, n_in = x.shape
    dims, dims_pad = prep["dims"], prep["dims_pad"]
    assert n_in == dims[0], (n_in, dims[0])
    cdt = prep["compute_dtype"]
    citem = cdt.itemsize
    out_dtype = x.dtype
    n_layers = len(prep["weights"])

    vmem_bytes, n_tc = _tpu_generation()
    budget = (
        int(vmem_budget_bytes) if vmem_budget_bytes is not None else int(vmem_bytes * 0.80)
    )

    # --- batch tiling (generation-aware) ------------------------------------
    m8 = _round_up(M, SUBLANE)
    tm_cap = 1024 if vmem_bytes >= (96 << 20) else 512
    tm = min(m8, tm_cap)
    # Split the batch only when there are 2 TensorCores to feed AND each half
    # is still a deep MXU tile (>=256 rows).  On 1-TC chips the grid is a
    # serial loop, so splitting only adds per-step overhead.
    if n_tc >= 2 and m8 // tm < 2 and m8 >= 2 * 256:
        tm = _round_up(_round_up(m8, 2 * SUBLANE) // 2, SUBLANE)
    m_pad = _round_up(m8, tm)
    grid = (m_pad // tm,)

    # --- pad / cast activations only when needed ----------------------------
    if m_pad == M and dims_pad[0] == n_in and x.dtype == cdt:
        x_op = x
    else:
        x_op = jnp.zeros((m_pad, dims_pad[0]), cdt).at[:M, :n_in].set(x.astype(cdt))

    # --- VMEM footprint of the fully-fused (weights-resident) plan ----------
    w_bytes = sum(dims_pad[i] * dims_pad[i + 1] for i in range(n_layers)) * citem
    b_bytes = sum(dims_pad[1:]) * 4
    act_bytes = 2 * tm * (dims_pad[0] * citem + dims_pad[-1] * out_dtype.itemsize)
    interm_bytes = 2 * tm * max(dims_pad) * (4 + citem)
    need_single = (w_bytes + b_bytes) + act_bytes + interm_bytes       # Buffered(1)
    need_double = 2 * (w_bytes + b_bytes) + act_bytes + interm_bytes   # default depth-2

    flops = 2 * m_pad * sum(dims_pad[i] * dims_pad[i + 1] for i in range(n_layers))
    bytes_accessed = int(
        m_pad * dims_pad[0] * citem + w_bytes + b_bytes
        + m_pad * dims_pad[-1] * out_dtype.itemsize
    )
    cost = pl.CostEstimate(flops=int(flops), transcendentals=0, bytes_accessed=bytes_accessed)

    if need_single <= budget:
        vmem_limit = int(min(vmem_bytes * 0.90, max(32 << 20, need_double + (16 << 20))))
        single_buffer = need_double > budget   # only when it decides fit vs no-fit
        try:
            out_pad = _run_fused(prep, x_op, out_dtype, with_relu, tm, grid,
                                 vmem_limit, cost, single_buffer_weights=single_buffer)
        except Exception:
            # pl.Buffered(1) rejected on this backend -> default double-buffered
            # resident weights (still a single fused call).
            out_pad = _run_fused(prep, x_op, out_dtype, with_relu, tm, grid,
                                 vmem_limit, cost, single_buffer_weights=False)
    else:
        # Weights too large to keep VMEM-resident on this generation: stream
        # them with an N/K grid + f32 accumulator per layer.
        out_pad = _run_streamed(prep, x_op, out_dtype, with_relu, tm, vmem_bytes)

    if m_pad == M and dims_pad[-1] == dims[-1]:
        return out_pad
    return out_pad[:M, : dims[-1]]


# ------------------------- params / reference -------------------------

def init_mlp_params(key, nIn, nOut, Hidlayer):
    """Deterministic init mirroring torch.nn.Linear default U[-1/sqrt(fan_in), 1/sqrt(fan_in)]."""
    dims = [nIn] + list(Hidlayer) + [nOut]
    params = []
    for d_in, d_out in zip(dims[:-1], dims[1:]):
        key, kw, kb = jax.random.split(key, 3)
        bound = 1.0 / jnp.sqrt(d_in)
        w = jax.random.uniform(kw, (d_in, d_out), jnp.float32, -bound, bound)
        b = jax.random.uniform(kb, (d_out,), jnp.float32, -bound, bound)
        params.append((w, b))
    return params


def mlp_reference(params, x, withReLU):
    h = x
    n_layers = len(params)
    for li, (w, b) in enumerate(params):
        h = h @ w + b
        if withReLU and li != n_layers - 1:
            h = jnp.maximum(h, 0.0)
    return h


if __name__ == "__main__":
    key = jax.random.PRNGKey(0)

    batch = 8
    nIn, nOut = 32, 16
    Hidlayer = [64, 48]
    withReLU = True

    kparam, kx = jax.random.split(key)
    params = init_mlp_params(kparam, nIn, nOut, Hidlayer)
    x = jax.random.normal(kx, (batch, nIn), jnp.float32)
    ref = mlp_reference(params, x, withReLU)

    # 1) f32 fused path (weights VMEM-resident).
    prep_f32 = prepare_mlp_params(params, nIn, compute_dtype=jnp.float32)
    out = jax.block_until_ready(mlp_pallas(prep_f32, x, withReLU))
    assert out.shape == (batch, nOut), out.shape
    assert jnp.allclose(out, ref, atol=1e-5, rtol=1e-5), float(jnp.max(jnp.abs(out - ref)))

    # 2) bf16 fused path: weights pre-cast once, f32 MXU accumulation + f32
    #    bias/ReLU epilogue.  NOTE: intermediate activations are re-cast to
    #    bf16 between layers, so error grows with depth.
    prep_bf16 = prepare_mlp_params(params, nIn, compute_dtype=jnp.bfloat16)
    out_bf16 = jax.block_until_ready(mlp_pallas(prep_bf16, x, withReLU))
    assert out_bf16.shape == (batch, nOut), out_bf16.shape
    assert float(jnp.max(jnp.abs(out_bf16 - ref))) < 0.25

    # 3) Force the single-buffered resident-weight plan (v7x footprint saver).
    out_sb = jax.block_until_ready(
        mlp_pallas(prep_f32, x, withReLU, vmem_budget_bytes=300_000))
    assert jnp.allclose(out_sb, ref, atol=1e-5, rtol=1e-5)

    # 4) Force the streamed-weight fallback (weights "too big" to stay resident).
    out_st = jax.block_until_ready(
        mlp_pallas(prep_f32, x, withReLU, vmem_budget_bytes=1))
    assert jnp.allclose(out_st, ref, atol=1e-5, rtol=1e-5)

    # 5) Non-8-multiple batch exercises the zero-pad path.
    x5 = jax.random.normal(jax.random.PRNGKey(1), (5, nIn), jnp.float32)
    out5 = jax.block_until_ready(mlp_pallas(prep_f32, x5, withReLU))
    assert jnp.allclose(out5, mlp_reference(params, x5, withReLU), atol=1e-5, rtol=1e-5)

    print("KERNEL_OK")
</pallas_src>

<mosaic_0001>
module attributes {stable_mosaic.version = 11 : i64} {
  func.func @_mlp_fused_kernel(%arg0: i32, %arg1: memref<8x128xf32, #tpu.memory_space<vmem>>, %arg2: memref<128x128xf32, #tpu.memory_space<vmem>>, %arg3: memref<1x128xf32, #tpu.memory_space<vmem>>, %arg4: memref<128x128xf32, #tpu.memory_space<vmem>>, %arg5: memref<1x128xf32, #tpu.memory_space<vmem>>, %arg6: memref<128x128xf32, #tpu.memory_space<vmem>>, %arg7: memref<1x128xf32, #tpu.memory_space<vmem>>, %arg8: memref<8x128xf32, #tpu.memory_space<vmem>>) attributes {dimension_semantics = [#tpu.dimension_semantics<parallel>], iteration_bounds = array<i64: 1>, scalar_prefetch = 0 : i64, scratch_operands = 0 : i64, tpu.core_type = #tpu.core_type<tc>, window_params = [{transform_indices = @transform_0, window_bounds = array<i64: 8, 128>}, {pipeline_mode = #tpu.pipeline_mode<synchronous>, transform_indices = @transform_1, window_bounds = array<i64: 128, 128>}, {pipeline_mode = #tpu.pipeline_mode<synchronous>, transform_indices = @transform_2, window_bounds = array<i64: 1, 128>}, {pipeline_mode = #tpu.pipeline_mode<synchronous>, transform_indices = @transform_3, window_bounds = array<i64: 128, 128>}, {pipeline_mode = #tpu.pipeline_mode<synchronous>, transform_indices = @transform_4, window_bounds = array<i64: 1, 128>}, {pipeline_mode = #tpu.pipeline_mode<synchronous>, transform_indices = @transform_5, window_bounds = array<i64: 128, 128>}, {pipeline_mode = #tpu.pipeline_mode<synchronous>, transform_indices = @transform_6, window_bounds = array<i64: 1, 128>}, {transform_indices = @transform_7, window_bounds = array<i64: 8, 128>}]} {
    %c0 = arith.constant 0 : index
    %c0_0 = arith.constant 0 : index
    %0 = vector.load %arg1[%c0, %c0_0] : memref<8x128xf32, #tpu.memory_space<vmem>>, vector<8x128xf32>
    %c0_1 = arith.constant 0 : index
    %c0_2 = arith.constant 0 : index
    %1 = vector.load %arg2[%c0_1, %c0_2] : memref<128x128xf32, #tpu.memory_space<vmem>>, vector<128x128xf32>
    %c0_3 = arith.constant 0 : index
    %c0_4 = arith.constant 0 : index
    %2 = vector.load %arg3[%c0_3, %c0_4] : memref<1x128xf32, #tpu.memory_space<vmem>>, vector<1x128xf32>
    %cst = arith.constant dense<0.000000e+00> : vector<8x128xf32>
    %3 = tpu.matmul %0, %1, %cst {dimension_numbers = #tpu.dot_dimension_numbers<[1], [0], [0], [1], [0, 0, 1, 1], [], []>} : vector<8x128xf32>, vector<128x128xf32>, vector<8x128xf32> -> vector<8x128xf32>
    %4 = vector.broadcast %2 : vector<1x128xf32> to vector<8x128xf32>
    %5 = arith.addf %3, %4 : vector<8x128xf32>
    %cst_5 = arith.constant 0.000000e+00 : f32
    %6 = vector.broadcast %cst_5 : f32 to vector<8x128xf32>
    %7 = arith.maximumf %5, %6 : vector<8x128xf32>
    %c0_6 = arith.constant 0 : index
    %c0_7 = arith.constant 0 : index
    %8 = vector.load %arg4[%c0_6, %c0_7] : memref<128x128xf32, #tpu.memory_space<vmem>>, vector<128x128xf32>
    %c0_8 = arith.constant 0 : index
    %c0_9 = arith.constant 0 : index
    %9 = vector.load %arg5[%c0_8, %c0_9] : memref<1x128xf32, #tpu.memory_space<vmem>>, vector<1x128xf32>
    %cst_10 = arith.constant dense<0.000000e+00> : vector<8x128xf32>
    %10 = tpu.matmul %7, %8, %cst_10 {dimension_numbers = #tpu.dot_dimension_numbers<[1], [0], [0], [1], [0, 0, 1, 1], [], []>} : vector<8x128xf32>, vector<128x128xf32>, vector<8x128xf32> -> vector<8x128xf32>
    %11 = vector.broadcast %9 : vector<1x128xf32> to vector<8x128xf32>
    %12 = arith.addf %10, %11 : vector<8x128xf32>
    %cst_11 = arith.constant 0.000000e+00 : f32
    %13 = vector.broadcast %cst_11 : f32 to vector<8x128xf32>
    %14 = arith.maximumf %12, %13 : vector<8x128xf32>
    %c0_12 = arith.constant 0 : index
    %c0_13 = arith.constant 0 : index
    %15 = vector.load %arg6[%c0_12, %c0_13] : memref<128x128xf32, #tpu.memory_space<vmem>>, vector<128x128xf32>
    %c0_14 = arith.constant 0 : index
    %c0_15 = arith.constant 0 : index
    %16 = vector.load %arg7[%c0_14, %c0_15] : memref<1x128xf32, #tpu.memory_space<vmem>>, vector<1x128xf32>
    %cst_16 = arith.constant dense<0.000000e+00> : vector<8x128xf32>
    %17 = tpu.matmul %14, %15, %cst_16 {dimension_numbers = #tpu.dot_dimension_numbers<[1], [0], [0], [1], [0, 0, 1, 1], [], []>} : vector<8x128xf32>, vector<128x128xf32>, vector<8x128xf32> -> vector<8x128xf32>
    %18 = vector.broadcast %16 : vector<1x128xf32> to vector<8x128xf32>
    %19 = arith.addf %17, %18 : vector<8x128xf32>
    %c0_17 = arith.constant 0 : index
    %c0_18 = arith.constant 0 : index
    %20 = vector.load %arg8[%c0_17, %c0_18] : memref<8x128xf32, #tpu.memory_space<vmem>>, vector<8x128xf32>
    tpu.vector_store %arg8[%c0_17, %c0_18], %19 {strides = array<i32>} : memref<8x128xf32, #tpu.memory_space<vmem>>, vector<8x128xf32>,
    return
  }
  func.func @transform_0(%arg0: i32) -> (i32, i32) {
    %c0_i32 = arith.constant 0 : i32
    %c0_i32_0 = arith.constant 0 : i32
    return %arg0, %c0_i32 : i32, i32
  }
  func.func @transform_1(%arg0: i32) -> (i32, i32) {
    %c0_i32 = arith.constant 0 : i32
    %c0_i32_0 = arith.constant 0 : i32
    %c0_i32_1 = arith.constant 0 : i32
    return %c0_i32, %c0_i32_0 : i32, i32
  }
  func.func @transform_2(%arg0: i32) -> (i32, i32) {
    %c0_i32 = arith.constant 0 : i32
    %c0_i32_0 = arith.constant 0 : i32
    %c0_i32_1 = arith.constant 0 : i32
    return %c0_i32, %c0_i32_0 : i32, i32
  }
  func.func @transform_3(%arg0: i32) -> (i32, i32) {
    %c0_i32 = arith.constant 0 : i32
    %c0_i32_0 = arith.constant 0 : i32
    %c0_i32_1 = arith.constant 0 : i32
    return %c0_i32, %c0_i32_0 : i32, i32
  }
  func.func @transform_4(%arg0: i32) -> (i32, i32) {
    %c0_i32 = arith.constant 0 : i32
    %c0_i32_0 = arith.constant 0 : i32
    %c0_i32_1 = arith.constant 0 : i32
    return %c0_i32, %c0_i32_0 : i32, i32
  }
  func.func @transform_5(%arg0: i32) -> (i32, i32) {
    %c0_i32 = arith.constant 0 : i32
    %c0_i32_0 = arith.constant 0 : i32
    %c0_i32_1 = arith.constant 0 : i32
    return %c0_i32, %c0_i32_0 : i32, i32
  }
  func.func @transform_6(%arg0: i32) -> (i32, i32) {
    %c0_i32 = arith.constant 0 : i32
    %c0_i32_0 = arith.constant 0 : i32
    %c0_i32_1 = arith.constant 0 : i32
    return %c0_i32, %c0_i32_0 : i32, i32
  }
  func.func @transform_7(%arg0: i32) -> (i32, i32) {
    %c0_i32 = arith.constant 0 : i32
    %c0_i32_0 = arith.constant 0 : i32
    return %arg0, %c0_i32 : i32, i32
  }
}

module attributes {stable_mosaic.version = 11 : i64} {
  func.func @_mlp_fused_kernel(%arg0: i32, %arg1: memref<8x128xf32, #tpu.memory_space<vmem>>, %arg2: memref<128x128xf32, #tpu.memory_space<vmem>>, %arg3: memref<1x128xf32, #tpu.memory_space<vmem>>, %arg4: memref<128x128xf32, #tpu.memory_space<vmem>>, %arg5: memref<1x128xf32, #tpu.memory_space<vmem>>, %arg6: memref<128x128xf32, #tpu.memory_space<vmem>>, %arg7: memref<1x128xf32, #tpu.memory_space<vmem>>, %arg8: memref<8x128xf32, #tpu.memory_space<vmem>>) attributes {dimension_semantics = [#tpu.dimension_semantics<parallel>], iteration_bounds = array<i64: 1>, scalar_prefetch = 0 : i64, scratch_operands = 0 : i64, tpu.core_type = #tpu.core_type<tc>, window_params = [{transform_indices = @transform_0, window_bounds = array<i64: 8, 128>}, {pipeline_mode = #tpu.pipeline_mode<synchronous>, transform_indices = @transform_1, window_bounds = array<i64: 128, 128>}, {pipeline_mode = #tpu.pipeline_mode<synchronous>, transform_indices = @transform_2, window_bounds = array<i64: 1, 128>}, {pipeline_mode = #tpu.pipeline_mode<synchronous>, transform_indices = @transform_3, window_bounds = array<i64: 128, 128>}, {pipeline_mode = #tpu.pipeline_mode<synchronous>, transform_indices = @transform_4, window_bounds = array<i64: 1, 128>}, {pipeline_mode = #tpu.pipeline_mode<synchronous>, transform_indices = @transform_5, window_bounds = array<i64: 128, 128>}, {pipeline_mode = #tpu.pipeline_mode<synchronous>, transform_indices = @transform_6, window_bounds = array<i64: 1, 128>}, {transform_indices = @transform_7, window_bounds = array<i64: 8, 128>}]} {
    %c0 = arith.constant 0 : index
    %c0_0 = arith.constant 0 : index
    %0 = vector.load %arg1[%c0, %c0_0] : memref<8x128xf32, #tpu.memory_space<vmem>>, vector<8x128xf32>
    %c0_1 = arith.constant 0 : index
    %c0_2 = arith.constant 0 : index
    %1 = vector.load %arg2[%c0_1, %c0_2] : memref<128x128xf32, #tpu.memory_space<vmem>>, vector<128x128xf32>
    %c0_3 = arith.constant 0 : index
    %c0_4 = arith.constant 0 : index
    %2 = vector.load %arg3[%c0_3, %c0_4] : memref<1x128xf32, #tpu.memory_space<vmem>>, vector<1x128xf32>
    %cst = arith.constant dense<0.000000e+00> : vector<8x128xf32>
    %3 = tpu.matmul %0, %1, %cst {dimension_numbers = #tpu.dot_dimension_numbers<[1], [0], [0], [1], [0, 0, 1, 1], [], []>} : vector<8x128xf32>, vector<128x128xf32>, vector<8x128xf32> -> vector<8x128xf32>
    %4 = vector.broadcast %2 : vector<1x128xf32> to vector<8x128xf32>
    %5 = arith.addf %3, %4 : vector<8x128xf32>
    %cst_5 = arith.constant 0.000000e+00 : f32
    %6 = vector.broadcast %cst_5 : f32 to vector<8x128xf32>
    %7 = arith.maximumf %5, %6 : vector<8x128xf32>
    %c0_6 = arith.constant 0 : index
    %c0_7 = arith.constant 0 : index
    %8 = vector.load %arg4[%c0_6, %c0_7] : memref<128x128xf32, #tpu.memory_space<vmem>>, vector<128x128xf32>
    %c0_8 = arith.constant 0 : index
    %c0_9 = arith.constant 0 : index
    %9 = vector.load %arg5[%c0_8, %c0_9] : memref<1x128xf32, #tpu.memory_space<vmem>>, vector<1x128xf32>
    %cst_10 = arith.constant dense<0.000000e+00> : vector<8x128xf32>
    %10 = tpu.matmul %7, %8, %cst_10 {dimension_numbers = #tpu.dot_dimension_numbers<[1], [0], [0], [1], [0, 0, 1, 1], [], []>} : vector<8x128xf32>, vector<128x128xf32>, vector<8x128xf32> -> vector<8x128xf32>
    %11 = vector.broadcast %9 : vector<1x128xf32> to vector<8x128xf32>
    %12 = arith.addf %10, %11 : vector<8x128xf32>
    %cst_11 = arith.constant 0.000000e+00 : f32
    %13 = vector.broadcast %cst_11 : f32 to vector<8x128xf32>
    %14 = arith.maximumf %12, %13 : vector<8x128xf32>
    %c0_12 = arith.constant 0 : index
    %c0_13 = arith.constant 0 : index
    %15 = vector.load %arg6[%c0_12, %c0_13] : memref<128x128xf32, #tpu.memory_space<vmem>>, vector<128x128xf32>
    %c0_14 = arith.constant 0 : index
    %c0_15 = arith.constant 0 : index
    %16 = vector.load %arg7[%c0_14, %c0_15] : memref<1x128xf32, #tpu.memory_space<vmem>>, vector<1x128xf32>
    %cst_16 = arith.constant dense<0.000000e+00> : vector<8x128xf32>
    %17 = tpu.matmul %14, %15, %cst_16 {dimension_numbers = #tpu.dot_dimension_numbers<[1], [0], [0], [1], [0, 0, 1, 1], [], []>} : vector<8x128xf32>, vector<128x128xf32>, vector<8x128xf32> -> vector<8x128xf32>
    %18 = vector.broadcast %16 : vector<1x128xf32> to vector<8x128xf32>
    %19 = arith.addf %17, %18 : vector<8x128xf32>
    %c0_17 = arith.constant 0 : index
    %c0_18 = arith.constant 0 : index
    %20 = vector.load %arg8[%c0_17, %c0_18] : memref<8x128xf32, #tpu.memory_space<vmem>>, vector<8x128xf32>
    tpu.vector_store %arg8[%c0_17, %c0_18], %19 {strides = array<i32>} : memref<8x128xf32, #tpu.memory_space<vmem>>, vector<8x128xf32>,
    return
  }
  func.func @transform_0(%arg0: i32) -> (i32, i32) {
    %c0_i32 = arith.constant 0 : i32
    %c0_i32_0 = arith.constant 0 : i32
    return %arg0, %c0_i32 : i32, i32
  }
  func.func @transform_1(%arg0: i32) -> (i32, i32) {
    %c0_i32 = arith.constant 0 : i32
    %c0_i32_0 = arith.constant 0 : i32
    %c0_i32_1 = arith.constant 0 : i32
    return %c0_i32, %c0_i32_0 : i32, i32
  }
  func.func @transform_2(%arg0: i32) -> (i32, i32) {
    %c0_i32 = arith.constant 0 : i32
    %c0_i32_0 = arith.constant 0 : i32
    %c0_i32_1 = arith.constant 0 : i32
    return %c0_i32, %c0_i32_0 : i32, i32
  }
  func.func @transform_3(%arg0: i32) -> (i32, i32) {
    %c0_i32 = arith.constant 0 : i32
    %c0_i32_0 = arith.constant 0 : i32
    %c0_i32_1 = arith.constant 0 : i32
    return %c0_i32, %c0_i32_0 : i32, i32
  }
  func.func @transform_4(%arg0: i32) -> (i32, i32) {
    %c0_i32 = arith.constant 0 : i32
    %c0_i32_0 = arith.constant 0 : i32
    %c0_i32_1 = arith.constant 0 : i32
    return %c0_i32, %c0_i32_0 : i32, i32
  }
  func.func @transform_5(%arg0: i32) -> (i32, i32) {
    %c0_i32 = arith.constant 0 : i32
    %c0_i32_0 = arith.constant 0 : i32
    %c0_i32_1 = arith.constant 0 : i32
    return %c0_i32, %c0_i32_0 : i32, i32
  }
  func.func @transform_6(%arg0: i32) -> (i32, i32) {
    %c0_i32 = arith.constant 0 : i32
    %c0_i32_0 = arith.constant 0 : i32
    %c0_i32_1 = arith.constant 0 : i32
    return %c0_i32, %c0_i32_0 : i32, i32
  }
  func.func @transform_7(%arg0: i32) -> (i32, i32) {
    %c0_i32 = arith.constant 0 : i32
    %c0_i32_0 = arith.constant 0 : i32
    return %arg0, %c0_i32 : i32, i32
  }
}

</mosaic_0001>

<bundles_post_ra>
// kernel: tpu_custom_call.1
= control target key start
LH: loop header
LB: loop body
LE: loop exit
PB: predicated region body
PF: predicated region fallthrough
CT: control target
= control target key end

     0   :  { %12 = vsyncpa [#allocation3], 0  ;;  %s440_s0 = inlined_call_operand.hbm [shape: f32[8,128], index: 0, kind: input, shape index: {}]   ;;  %s441_s1 = inlined_call_operand.hbm [shape: f32[128,128], index: 1, kind: input, shape index: {}]   ;;  %s442_s2 = inlined_call_operand.vmem [shape: f32[1,128], index: 2, kind: input, shape index: {}]   ;;  %s443_s3 = inlined_call_operand.hbm [shape: f32[128,128], index: 3, kind: input, shape index: {}]   ;;  %s444_s4 = inlined_call_operand.vmem [shape: f32[1,128], index: 4, kind: input, shape index: {}]   ;;  %s445_s5 = inlined_call_operand.hbm [shape: f32[128,128], index: 5, kind: input, shape index: {}]   ;;  %s446_s6 = inlined_call_operand.vmem [shape: f32[1,128], index: 6, kind: input, shape index: {}]   ;;  %s447_s7 = inlined_call_operand.hbm [shape: f32[8,128], index: 7, kind: output, shape index: {}]  }
   0x1   :  { %13 = vsyncpa [#allocation6], 0 }
   0x2   :  { %14 = vsyncpa [#allocation9], 0  ;;  %s31_s26 = sshll.u32 %s441_s1, 4  ;;  %s32_s26 = int_to_ptr.hbm [resolvable:$true] %s31_s26 }
   0x3   :  { %15 = vsyncpa [#allocation4], 0  ;;  %s369_s27 = smov [#allocation5]   ;;  %s21_s8 = sshll.u32 %s440_s0, 4  ;;  %s22_s8 = int_to_ptr.hbm [resolvable:$true] %s21_s8 }
   0x4   :  { %s33_s28 = sshll.u32 %s369_s27, 4  ;;  %s370_s9 = smov 128   ;;  %s34_s28 = int_to_ptr.vmem [resolvable:$true] %s33_s28 }
   0x5   :  { %s371_s10 = smov 8   ;;  %s372_s11 = smov [#allocation2]  }
   0x6   :  { %39 = dma.hbm_to_vmem [thread:$0]  %s32_s26, 2048, %s34_s28, [#allocation6], %s370_s9, %s370_s9, %s371_s10  }
   0x7   :  { %s23_s12 = sshll.u32 %s372_s11, 4  ;;  %s46_s15 = sshll.u32 %s443_s3, 4  ;;  %s24_s12 = int_to_ptr.vmem [resolvable:$true] %s23_s12  ;;  %s47_s15 = int_to_ptr.hbm [resolvable:$true] %s46_s15 }
   0x8   :  { %26 = dma.hbm_to_vmem [thread:$0]  %s22_s8, 128, %s24_s12, [#allocation3]  }
   0x9   :  { %s61_s17 = sshll.u32 %s445_s5, 4  ;;  %s373_s18 = smov [#allocation7]   ;;  %s62_s17 = int_to_ptr.hbm [resolvable:$true] %s61_s17 }
   0xa   :  { %s48_s19 = sshll.u32 %s373_s18, 4  ;;  %s374_s0 = smov [#allocation8]   ;;  %s49_s19 = int_to_ptr.vmem [resolvable:$true] %s48_s19 }
   0xb   :  { %54 = dma.hbm_to_vmem [thread:$0]  %s47_s15, 2048, %s49_s19, [#allocation6], %s370_s9, %s370_s9, %s371_s10  }
   0xc   :  { %s63_s20 = sshll.u32 %s374_s0, 4  ;;  %s64_s20 = int_to_ptr.vmem [resolvable:$true] %s63_s20 }
   0xd   :  { %69 = dma.hbm_to_vmem [thread:$0]  %s62_s17, 2048, %s64_s20, [#allocation9], %s370_s9, %s370_s9, %s371_s10  }
   0xe   :  { %361 = dma.done.wait [#allocation3], 128  }
   0xf   :  { %362 = vsyncadd [#allocation3], 4294967168 }
  0x10   :  { %363 = dma.done.wait [#allocation6], 4096  }
  0x11   :  { %364 = vsyncadd [#allocation6], 4294963200 }
  0x12   :  { %365 = dma.done.wait [#allocation9], 2048  }
  0x13   :  { %366 = vsyncadd [#allocation9], 4294965248  ;;  %v104_v0 = vld [vmem:[#allocation5 + $0x78] sm:$0xff]  ;;  %v103_v1 = vld [vmem:[#allocation5 + $0x70] sm:$0xff]  ;;  %s375_s24 = smov [#allocation10]   ;;  %s219_s28 = sshll.u32 %s447_s7, 4  ;;  %s220_s28 = int_to_ptr.hbm [resolvable:$true] %s219_s28 }
  0x14   :  { %109 = vmatpush.msra.mxu0 %v104_v0  ;;  %v102_v2 = vld [vmem:[#allocation5 + $0x68] sm:$0xff]  ;;  %v101_v3 = vld [vmem:[#allocation5 + $0x60] sm:$0xff]  ;;  %v145_v4 = vld [vmem:[#allocation7 + $0x78] sm:$0xff]  ;;  %s217_s25 = sshll.u32 %s375_s24, 4  ;;  %s218_s25 = int_to_ptr.vmem [resolvable:$true] %s217_s25 }
  0x15   :  { %v100_v5 = vld [vmem:[#allocation5 + $0x58] sm:$0xff]  ;;  %150 = vmatpush.msra.mxu1 %v145_v4  ;;  %v144_v6 = vld [vmem:[#allocation7 + $0x70] sm:$0xff]  ;;  %v143_v7 = vld [vmem:[#allocation7 + $0x68] sm:$0xff] }
  0x16   :  { %110 = vmatpush.msra.mxu0 %v103_v1  ;;  %v99_v8 = vld [vmem:[#allocation5 + $0x50] sm:$0xff]  ;;  %v142_v9 = vld [vmem:[#allocation7 + $0x60] sm:$0xff]  ;;  %v98_v10 = vld [vmem:[#allocation5 + $0x48] sm:$0xff] }
  0x17   :  { %151 = vmatpush.msra.mxu1 %v144_v6  ;;  %v141_v11 = vld [vmem:[#allocation7 + $0x58] sm:$0xff]  ;;  %v97_v12 = vld [vmem:[#allocation5 + $0x40] sm:$0xff]  ;;  %v140_v13 = vld [vmem:[#allocation7 + $0x50] sm:$0xff] }
  0x18   :  { %111 = vmatpush.msra.mxu0 %v102_v2  ;;  %v96_v14 = vld [vmem:[#allocation5 + $0x38] sm:$0xff]  ;;  %v139_v15 = vld [vmem:[#allocation7 + $0x48] sm:$0xff]  ;;  %v95_v16 = vld [vmem:[#allocation5 + $0x30] sm:$0xff] }
  0x19   :  { %152 = vmatpush.msra.mxu1 %v143_v7  ;;  %v138_v17 = vld [vmem:[#allocation7 + $0x40] sm:$0xff]  ;;  %v94_v18 = vld [vmem:[#allocation5 + $0x28] sm:$0xff]  ;;  %v137_v19 = vld [vmem:[#allocation7 + $0x38] sm:$0xff] }
  0x1a   :  { %112 = vmatpush.msra.mxu0 %v101_v3  ;;  %v93_v20 = vld [vmem:[#allocation5 + $0x20] sm:$0xff]  ;;  %v136_v21 = vld [vmem:[#allocation7 + $0x30] sm:$0xff]  ;;  %v92_v22 = vld [vmem:[#allocation5 + $0x18] sm:$0xff] }
  0x1b   :  { %153 = vmatpush.msra.mxu1 %v142_v9  ;;  %v135_v23 = vld [vmem:[#allocation7 + $0x28] sm:$0xff]  ;;  %v91_v24 = vld [vmem:[#allocation5 + $0x10] sm:$0xff]  ;;  %v134_v25 = vld [vmem:[#allocation7 + $0x20] sm:$0xff] }
  0x1c   :  { %113 = vmatpush.msra.mxu0 %v100_v5  ;;  %v90_v26 = vld [vmem:[#allocation5 + $0x8] sm:$0xff]  ;;  %v133_v27 = vld [vmem:[#allocation7 + $0x18] sm:$0xff]  ;;  %v89_v28 = vld [vmem:[#allocation5] sm:$0xff] }
  0x1d   :  { %154 = vmatpush.msra.mxu1 %v141_v11  ;;  %v88_v29 = vld [vmem:[#allocation2] sm:$0xff]  ;;  %v132_v30 = vld [vmem:[#allocation7 + $0x10] sm:$0xff]  ;;  %v131_v31 = vld [vmem:[#allocation7 + $0x8] sm:$0xff] }
  0x1e   :  { %114 = vmatpush.msra.mxu0 %v99_v8  ;;  %v130_v32 = vld [vmem:[#allocation7] sm:$0xff]  ;;  %v186_v33 = vld [vmem:[#allocation8 + $0x78] sm:$0xff]  ;;  %v185_v34 = vld [vmem:[#allocation8 + $0x70] sm:$0xff] }
  0x1f   :  { %155 = vmatpush.msra.mxu1 %v140_v13  ;;  %191 = vmatpush.msra.mxu2 %v186_v33  ;;  %v184_v35 = vld [vmem:[#allocation8 + $0x68] sm:$0xff]  ;;  %v183_v36 = vld [vmem:[#allocation8 + $0x60] sm:$0xff]  ;;  %v182_v37 = vld [vmem:[#allocation8 + $0x58] sm:$0xff] }
  0x20   :  { %115 = vmatpush.msra.mxu0 %v98_v10  ;;  %v181_v38 = vld [vmem:[#allocation8 + $0x50] sm:$0xff]  ;;  %v180_v39 = vld [vmem:[#allocation8 + $0x48] sm:$0xff]  ;;  %v179_v40 = vld [vmem:[#allocation8 + $0x40] sm:$0xff] }
  0x21   :  { %156 = vmatpush.msra.mxu1 %v139_v15  ;;  %192 = vmatpush.msra.mxu2 %v185_v34  ;;  %v178_v41 = vld [vmem:[#allocation8 + $0x38] sm:$0xff]  ;;  %v177_v42 = vld [vmem:[#allocation8 + $0x30] sm:$0xff]  ;;  %v176_v43 = vld [vmem:[#allocation8 + $0x28] sm:$0xff] }
  0x22   :  { %116 = vmatpush.msra.mxu0 %v97_v12  ;;  %v175_v44 = vld [vmem:[#allocation8 + $0x20] sm:$0xff]  ;;  %v174_v45 = vld [vmem:[#allocation8 + $0x18] sm:$0xff]  ;;  %v173_v50 = vld [vmem:[#allocation8 + $0x10] sm:$0xff] }
  0x23   :  { %157 = vmatpush.msra.mxu1 %v138_v17  ;;  %193 = vmatpush.msra.mxu2 %v184_v35  ;;  %v238_v46 = vld [vmem:[%s442_s2] ss:$0 sm:$0xff]  ;;  %v172_v51 = vld [vmem:[#allocation8 + $0x8] sm:$0xff]  ;;  %v171_v52 = vld [vmem:[#allocation8] sm:$0xff] }
  0x24   :  { %117 = vmatpush.msra.mxu0 %v96_v14  ;;  %v239_v53 = vld [vmem:[%s444_s4] ss:$0 sm:$0xff] }
  0x25   :  { %158 = vmatpush.msra.mxu1 %v137_v19  ;;  %194 = vmatpush.msra.mxu2 %v183_v36  ;;  %v240_v57 = vld [vmem:[%s446_s6] ss:$0 sm:$0xff] }
  0x26   :  { %118 = vmatpush.msra.mxu0 %v95_v16 }
  0x27   :  { %159 = vmatpush.msra.mxu1 %v136_v21  ;;  %195 = vmatpush.msra.mxu2 %v182_v37 }
  0x28   :  { %119 = vmatpush.msra.mxu0 %v94_v18 }
  0x29   :  { %160 = vmatpush.msra.mxu1 %v135_v23  ;;  %196 = vmatpush.msra.mxu2 %v181_v38 }
  0x2a   :  { %120 = vmatpush.msra.mxu0 %v93_v20 }
  0x2b   :  { %161 = vmatpush.msra.mxu1 %v134_v25  ;;  %197 = vmatpush.msra.mxu2 %v180_v39 }
  0x2c   :  { %121 = vmatpush.msra.mxu0 %v92_v22 }
  0x2d   :  { %162 = vmatpush.msra.mxu1 %v133_v27  ;;  %198 = vmatpush.msra.mxu2 %v179_v40 }
  0x2e   :  { %122 = vmatpush.msra.mxu0 %v91_v24 }
  0x2f   :  { %163 = vmatpush.msra.mxu1 %v132_v30  ;;  %199 = vmatpush.msra.mxu2 %v178_v41 }
  0x30   :  { %123 = vmatpush.msra.mxu0 %v90_v26 }
  0x31   :  { %164 = vmatpush.msra.mxu1 %v131_v31  ;;  %200 = vmatpush.msra.mxu2 %v177_v42 }
  0x32   :  { %124 = vmatpush.msra.mxu0 %v89_v28 }
  0x33   :  { %125 = vmatmul.f32.vlgmr.msra.gmra.mxu0 %v88_v29  ;;  %165 = vmatpush.msra.mxu1 %v130_v32 }
  0x34   :  { %201 = vmatpush.msra.mxu2 %v176_v43 }
  0x36   :  { %202 = vmatpush.msra.mxu2 %v175_v44 }
  0x38   :  { %203 = vmatpush.msra.mxu2 %v174_v45 }
  0x3a   :  { %204 = vmatpush.msra.mxu2 %v173_v50 }
  0x3c   :  { %205 = vmatpush.msra.mxu2 %v172_v51 }
  0x3e   :  { %206 = vmatpush.msra.mxu2 %v171_v52 }
  0xb0   :  { %v126_v47 = vpop.f32.mrf.mxu0 }
  0xb1   :  { %v127_v48 = vadd.f32 %v238_v46, %v126_v47 }
  0xb3   :  { %v129_v49 = vmax.f32 %v127_v48, 0.0 }
  0xb5   :  { %166 = vmatmul.f32.vlgmr.msra.gmra.mxu1 %v129_v49 }
 0x132   :  { %v167_v54 = vpop.f32.mrf.mxu1 }
 0x133   :  { %v168_v55 = vadd.f32 %v239_v53, %v167_v54 }
 0x135   :  { %v170_v56 = vmax.f32 %v168_v55, 0.0 }
 0x137   :  { %207 = vmatmul.f32.vlgmr.msra.gmra.mxu2 %v170_v56 }
 0x1ba   :  { %v208_v58 = vpop.f32.mrf.mxu2 }
 0x1bb   :  { %v209_v59 = vadd.f32 %v240_v57, %v208_v58 }
 0x1bd   :  { %211 = vst [vmem:[#allocation10] sm:$0xff] %v209_v59 }
 0x1be   :  { %222 = dma.vmem_to_hbm [thread:$0]  %s218_s25, 128, %s220_s28, [#allocation4]  }
 0x1bf   :  { %367 = dma.done.wait [#allocation4], 128  }
 0x1c0   :  { %368 = vsyncadd [#allocation4], 4294967168 }
 0x1c1   :  { %227 = vsyncpa [#allocation3], 1 }
 0x1c2   :  { %228 = vsyncpa [#allocation6], 1 }
 0x1c3   :  { %229 = vsyncpa [#allocation9], 1 }
 0x1c4   :  { %230 = vsyncpa [#allocation4], 1 }

// kernel: tpu_custom_call.1
= control target key start
LH: loop header
LB: loop body
LE: loop exit
PB: predicated region body
PF: predicated region fallthrough
CT: control target
= control target key end

     0   :  { %12 = vsyncpa [#allocation3], 0  ;;  %s440_s0 = inlined_call_operand.hbm [shape: f32[8,128], index: 0, kind: input, shape index: {}]   ;;  %s441_s1 = inlined_call_operand.hbm [shape: f32[128,128], index: 1, kind: input, shape index: {}]   ;;  %s442_s2 = inlined_call_operand.vmem [shape: f32[1,128], index: 2, kind: input, shape index: {}]   ;;  %s443_s3 = inlined_call_operand.hbm [shape: f32[128,128], index: 3, kind: input, shape index: {}]   ;;  %s444_s4 = inlined_call_operand.vmem [shape: f32[1,128], index: 4, kind: input, shape index: {}]   ;;  %s445_s5 = inlined_call_operand.hbm [shape: f32[128,128], index: 5, kind: input, shape index: {}]   ;;  %s446_s6 = inlined_call_operand.vmem [shape: f32[1,128], index: 6, kind: input, shape index: {}]   ;;  %s447_s7 = inlined_call_operand.hbm [shape: f32[8,128], index: 7, kind: output, shape index: {}]  }
   0x1   :  { %13 = vsyncpa [#allocation6], 0 }
   0x2   :  { %14 = vsyncpa [#allocation9], 0  ;;  %s31_s26 = sshll.u32 %s441_s1, 4  ;;  %s32_s26 = int_to_ptr.hbm [resolvable:$true] %s31_s26 }
   0x3   :  { %15 = vsyncpa [#allocation4], 0  ;;  %s369_s27 = smov [#allocation5]   ;;  %s21_s8 = sshll.u32 %s440_s0, 4  ;;  %s22_s8 = int_to_ptr.hbm [resolvable:$true] %s21_s8 }
   0x4   :  { %s33_s28 = sshll.u32 %s369_s27, 4  ;;  %s370_s9 = smov 128   ;;  %s34_s28 = int_to_ptr.vmem [resolvable:$true] %s33_s28 }
   0x5   :  { %s371_s10 = smov 8   ;;  %s372_s11 = smov [#allocation2]  }
   0x6   :  { %39 = dma.hbm_to_vmem [thread:$0]  %s32_s26, 2048, %s34_s28, [#allocation6], %s370_s9, %s370_s9, %s371_s10  }
   0x7   :  { %s23_s12 = sshll.u32 %s372_s11, 4  ;;  %s46_s15 = sshll.u32 %s443_s3, 4  ;;  %s24_s12 = int_to_ptr.vmem [resolvable:$true] %s23_s12  ;;  %s47_s15 = int_to_ptr.hbm [resolvable:$true] %s46_s15 }
   0x8   :  { %26 = dma.hbm_to_vmem [thread:$0]  %s22_s8, 128, %s24_s12, [#allocation3]  }
   0x9   :  { %s61_s17 = sshll.u32 %s445_s5, 4  ;;  %s373_s18 = smov [#allocation7]   ;;  %s62_s17 = int_to_ptr.hbm [resolvable:$true] %s61_s17 }
   0xa   :  { %s48_s19 = sshll.u32 %s373_s18, 4  ;;  %s374_s0 = smov [#allocation8]   ;;  %s49_s19 = int_to_ptr.vmem [resolvable:$true] %s48_s19 }
   0xb   :  { %54 = dma.hbm_to_vmem [thread:$0]  %s47_s15, 2048, %s49_s19, [#allocation6], %s370_s9, %s370_s9, %s371_s10  }
   0xc   :  { %s63_s20 = sshll.u32 %s374_s0, 4  ;;  %s64_s20 = int_to_ptr.vmem [resolvable:$true] %s63_s20 }
   0xd   :  { %69 = dma.hbm_to_vmem [thread:$0]  %s62_s17, 2048, %s64_s20, [#allocation9], %s370_s9, %s370_s9, %s371_s10  }
   0xe   :  { %361 = dma.done.wait [#allocation3], 128  }
   0xf   :  { %362 = vsyncadd [#allocation3], 4294967168 }
  0x10   :  { %363 = dma.done.wait [#allocation6], 4096  }
  0x11   :  { %364 = vsyncadd [#allocation6], 4294963200 }
  0x12   :  { %365 = dma.done.wait [#allocation9], 2048  }
  0x13   :  { %366 = vsyncadd [#allocation9], 4294965248  ;;  %v104_v0 = vld [vmem:[#allocation5 + $0x78] sm:$0xff]  ;;  %v103_v1 = vld [vmem:[#allocation5 + $0x70] sm:$0xff]  ;;  %s375_s24 = smov [#allocation10]   ;;  %s219_s28 = sshll.u32 %s447_s7, 4  ;;  %s220_s28 = int_to_ptr.hbm [resolvable:$true] %s219_s28 }
  0x14   :  { %109 = vmatpush.msra.mxu0 %v104_v0  ;;  %v102_v2 = vld [vmem:[#allocation5 + $0x68] sm:$0xff]  ;;  %v101_v3 = vld [vmem:[#allocation5 + $0x60] sm:$0xff]  ;;  %v145_v4 = vld [vmem:[#allocation7 + $0x78] sm:$0xff]  ;;  %s217_s25 = sshll.u32 %s375_s24, 4  ;;  %s218_s25 = int_to_ptr.vmem [resolvable:$true] %s217_s25 }
  0x15   :  { %v100_v5 = vld [vmem:[#allocation5 + $0x58] sm:$0xff]  ;;  %150 = vmatpush.msra.mxu1 %v145_v4  ;;  %v144_v6 = vld [vmem:[#allocation7 + $0x70] sm:$0xff]  ;;  %v143_v7 = vld [vmem:[#allocation7 + $0x68] sm:$0xff] }
  0x16   :  { %110 = vmatpush.msra.mxu0 %v103_v1  ;;  %v99_v8 = vld [vmem:[#allocation5 + $0x50] sm:$0xff]  ;;  %v142_v9 = vld [vmem:[#allocation7 + $0x60] sm:$0xff]  ;;  %v98_v10 = vld [vmem:[#allocation5 + $0x48] sm:$0xff] }
  0x17   :  { %151 = vmatpush.msra.mxu1 %v144_v6  ;;  %v141_v11 = vld [vmem:[#allocation7 + $0x58] sm:$0xff]  ;;  %v97_v12 = vld [vmem:[#allocation5 + $0x40] sm:$0xff]  ;;  %v140_v13 = vld [vmem:[#allocation7 + $0x50] sm:$0xff] }
  0x18   :  { %111 = vmatpush.msra.mxu0 %v102_v2  ;;  %v96_v14 = vld [vmem:[#allocation5 + $0x38] sm:$0xff]  ;;  %v139_v15 = vld [vmem:[#allocation7 + $0x48] sm:$0xff]  ;;  %v95_v16 = vld [vmem:[#allocation5 + $0x30] sm:$0xff] }
  0x19   :  { %152 = vmatpush.msra.mxu1 %v143_v7  ;;  %v138_v17 = vld [vmem:[#allocation7 + $0x40] sm:$0xff]  ;;  %v94_v18 = vld [vmem:[#allocation5 + $0x28] sm:$0xff]  ;;  %v137_v19 = vld [vmem:[#allocation7 + $0x38] sm:$0xff] }
  0x1a   :  { %112 = vmatpush.msra.mxu0 %v101_v3  ;;  %v93_v20 = vld [vmem:[#allocation5 + $0x20] sm:$0xff]  ;;  %v136_v21 = vld [vmem:[#allocation7 + $0x30] sm:$0xff]  ;;  %v92_v22 = vld [vmem:[#allocation5 + $0x18] sm:$0xff] }
  0x1b   :  { %153 = vmatpush.msra.mxu1 %v142_v9  ;;  %v135_v23 = vld [vmem:[#allocation7 + $0x28] sm:$0xff]  ;;  %v91_v24 = vld [vmem:[#allocation5 + $0x10] sm:$0xff]  ;;  %v134_v25 = vld [vmem:[#allocation7 + $0x20] sm:$0xff] }
  0x1c   :  { %113 = vmatpush.msra.mxu0 %v100_v5  ;;  %v90_v26 = vld [vmem:[#allocation5 + $0x8] sm:$0xff]  ;;  %v133_v27 = vld [vmem:[#allocation7 + $0x18] sm:$0xff]  ;;  %v89_v28 = vld [vmem:[#allocation5] sm:$0xff] }
  0x1d   :  { %154 = vmatpush.msra.mxu1 %v141_v11  ;;  %v88_v29 = vld [vmem:[#allocation2] sm:$0xff]  ;;  %v132_v30 = vld [vmem:[#allocation7 + $0x10] sm:$0xff]  ;;  %v131_v31 = vld [vmem:[#allocation7 + $0x8] sm:$0xff] }
  0x1e   :  { %114 = vmatpush.msra.mxu0 %v99_v8  ;;  %v130_v32 = vld [vmem:[#allocation7] sm:$0xff]  ;;  %v186_v33 = vld [vmem:[#allocation8 + $0x78] sm:$0xff]  ;;  %v185_v34 = vld [vmem:[#allocation8 + $0x70] sm:$0xff] }
  0x1f   :  { %155 = vmatpush.msra.mxu1 %v140_v13  ;;  %191 = vmatpush.msra.mxu2 %v186_v33  ;;  %v184_v35 = vld [vmem:[#allocation8 + $0x68] sm:$0xff]  ;;  %v183_v36 = vld [vmem:[#allocation8 + $0x60] sm:$0xff]  ;;  %v182_v37 = vld [vmem:[#allocation8 + $0x58] sm:$0xff] }
  0x20   :  { %115 = vmatpush.msra.mxu0 %v98_v10  ;;  %v181_v38 = vld [vmem:[#allocation8 + $0x50] sm:$0xff]  ;;  %v180_v39 = vld [vmem:[#allocation8 + $0x48] sm:$0xff]  ;;  %v179_v40 = vld [vmem:[#allocation8 + $0x40] sm:$0xff] }
  0x21   :  { %156 = vmatpush.msra.mxu1 %v139_v15  ;;  %192 = vmatpush.msra.mxu2 %v185_v34  ;;  %v178_v41 = vld [vmem:[#allocation8 + $0x38] sm:$0xff]  ;;  %v177_v42 = vld [vmem:[#allocation8 + $0x30] sm:$0xff]  ;;  %v176_v43 = vld [vmem:[#allocation8 + $0x28] sm:$0xff] }
  0x22   :  { %116 = vmatpush.msra.mxu0 %v97_v12  ;;  %v175_v44 = vld [vmem:[#allocation8 + $0x20] sm:$0xff]  ;;  %v174_v45 = vld [vmem:[#allocation8 + $0x18] sm:$0xff]  ;;  %v173_v50 = vld [vmem:[#allocation8 + $0x10] sm:$0xff] }
  0x23   :  { %157 = vmatpush.msra.mxu1 %v138_v17  ;;  %193 = vmatpush.msra.mxu2 %v184_v35  ;;  %v238_v46 = vld [vmem:[%s442_s2] ss:$0 sm:$0xff]  ;;  %v172_v51 = vld [vmem:[#allocation8 + $0x8] sm:$0xff]  ;;  %v171_v52 = vld [vmem:[#allocation8] sm:$0xff] }
  0x24   :  { %117 = vmatpush.msra.mxu0 %v96_v14  ;;  %v239_v53 = vld [vmem:[%s444_s4] ss:$0 sm:$0xff] }
  0x25   :  { %158 = vmatpush.msra.mxu1 %v137_v19  ;;  %194 = vmatpush.msra.mxu2 %v183_v36  ;;  %v240_v57 = vld [vmem:[%s446_s6] ss:$0 sm:$0xff] }
  0x26   :  { %118 = vmatpush.msra.mxu0 %v95_v16 }
  0x27   :  { %159 = vmatpush.msra.mxu1 %v136_v21  ;;  %195 = vmatpush.msra.mxu2 %v182_v37 }
  0x28   :  { %119 = vmatpush.msra.mxu0 %v94_v18 }
  0x29   :  { %160 = vmatpush.msra.mxu1 %v135_v23  ;;  %196 = vmatpush.msra.mxu2 %v181_v38 }
  0x2a   :  { %120 = vmatpush.msra.mxu0 %v93_v20 }
  0x2b   :  { %161 = vmatpush.msra.mxu1 %v134_v25  ;;  %197 = vmatpush.msra.mxu2 %v180_v39 }
  0x2c   :  { %121 = vmatpush.msra.mxu0 %v92_v22 }
  0x2d   :  { %162 = vmatpush.msra.mxu1 %v133_v27  ;;  %198 = vmatpush.msra.mxu2 %v179_v40 }
  0x2e   :  { %122 = vmatpush.msra.mxu0 %v91_v24 }
  0x2f   :  { %163 = vmatpush.msra.mxu1 %v132_v30  ;;  %199 = vmatpush.msra.mxu2 %v178_v41 }
  0x30   :  { %123 = vmatpush.msra.mxu0 %v90_v26 }
  0x31   :  { %164 = vmatpush.msra.mxu1 %v131_v31  ;;  %200 = vmatpush.msra.mxu2 %v177_v42 }
  0x32   :  { %124 = vmatpush.msra.mxu0 %v89_v28 }
  0x33   :  { %125 = vmatmul.f32.vlgmr.msra.gmra.mxu0 %v88_v29  ;;  %165 = vmatpush.msra.mxu1 %v130_v32 }
  0x34   :  { %201 = vmatpush.msra.mxu2 %v176_v43 }
  0x36   :  { %202 = vmatpush.msra.mxu2 %v175_v44 }
  0x38   :  { %203 = vmatpush.msra.mxu2 %v174_v45 }
  0x3a   :  { %204 = vmatpush.msra.mxu2 %v173_v50 }
  0x3c   :  { %205 = vmatpush.msra.mxu2 %v172_v51 }
  0x3e   :  { %206 = vmatpush.msra.mxu2 %v171_v52 }
  0xb0   :  { %v126_v47 = vpop.f32.mrf.mxu0 }
  0xb1   :  { %v127_v48 = vadd.f32 %v238_v46, %v126_v47 }
  0xb3   :  { %v129_v49 = vmax.f32 %v127_v48, 0.0 }
  0xb5   :  { %166 = vmatmul.f32.vlgmr.msra.gmra.mxu1 %v129_v49 }
 0x132   :  { %v167_v54 = vpop.f32.mrf.mxu1 }
 0x133   :  { %v168_v55 = vadd.f32 %v239_v53, %v167_v54 }
 0x135   :  { %v170_v56 = vmax.f32 %v168_v55, 0.0 }
 0x137   :  { %207 = vmatmul.f32.vlgmr.msra.gmra.mxu2 %v170_v56 }
 0x1ba   :  { %v208_v58 = vpop.f32.mrf.mxu2 }
 0x1bb   :  { %v209_v59 = vadd.f32 %v240_v57, %v208_v58 }
 0x1bd   :  { %211 = vst [vmem:[#allocation10] sm:$0xff] %v209_v59 }
 0x1be   :  { %222 = dma.vmem_to_hbm [thread:$0]  %s218_s25, 128, %s220_s28, [#allocation4]  }
 0x1bf   :  { %367 = dma.done.wait [#allocation4], 128  }
 0x1c0   :  { %368 = vsyncadd [#allocation4], 4294967168 }
 0x1c1   :  { %227 = vsyncpa [#allocation3], 1 }
 0x1c2   :  { %228 = vsyncpa [#allocation6], 1 }
 0x1c3   :  { %229 = vsyncpa [#allocation9], 1 }
 0x1c4   :  { %230 = vsyncpa [#allocation4], 1 }

</bundles_post_ra>
